<compile_context>
chip_gen: v6e
topology: v6e:2x2x1
jax: 0.10.0
libtpu: 0.0.40
codegen_flags: <defaults>
</compile_context>

<pallas_src>
import functools

import jax
import jax.numpy as jnp
from jax.experimental import pallas as pl
from jax.experimental.pallas import tpu as pltpu


# ---------------- in-kernel helpers ----------------

def _block_row_mask_sum(loss, n_rows, tile):
    """Sum per-row losses (T, 1) of this block, zeroing rows past the end of the array."""
    t = loss.shape[0]
    i = pl.program_id(0)
    row = jax.lax.broadcasted_iota(jnp.int32, (t, 1), 0)
    valid = row < (n_rows - i * tile)          # all-true except for the partial last block
    return jnp.sum(jnp.where(valid, loss, 0.0))


def _store_block_sum(out_ref, s):
    # Lane-dense, unmasked store of the per-block partial sum; wrapper reads lane 0.
    out_ref[...] = jnp.broadcast_to(s, (1, 1, 128))


# ---------------- kernels (one row-block per grid step) ----------------

def _ce_plain_kernel(pred_ref, tgt_ref, out_ref, *, n_rows, tile):
    # per-row: loss_i = -pred[i, t_i] + log(sum_j exp(pred[i, j] + eps))
    eps = 1e-12
    pred = pred_ref[...].astype(jnp.float32)                 # (T, C), upcast in-register
    tgt = tgt_ref[...]                                       # (T, 1) int32
    t, c = pred.shape
    col = jax.lax.broadcasted_iota(jnp.int32, (t, c), 1)
    # gathered logit via select (no one-hot f32 tile); out-of-range targets silently give 0
    # TODO(synk): torch raises on out-of-range targets; add pl.debug_check if needed.
    g = jnp.sum(jnp.where(col == tgt, pred, 0.0), axis=1, keepdims=True)          # (T, 1)
    m = jnp.max(pred, axis=1, keepdims=True)
    # log(sum(exp(p + eps))) == eps + logsumexp(p): fold eps into the (T, 1) result.
    lse = m + jnp.log(jnp.sum(jnp.exp(pred - m), axis=1, keepdims=True)) + eps    # (T, 1)
    _store_block_sum(out_ref, _block_row_mask_sum(lse - g, n_rows, tile))


def _ce_smooth_kernel(pred_ref, tgt_ref, out_ref, *, label_smooth, class_num, n_rows, tile):
    # smoothed one-hot = lo + (hi - lo) * onehot; with logp_ij = pred_ij - LSE_i:
    #   loss_i = (lo*C + hi - lo) * LSE_i - lo * sum_j pred_ij - (hi - lo) * pred[i, t_i]
    # (no full (T, C) logprobs tile is ever formed)
    pred = pred_ref[...].astype(jnp.float32)                 # (T, C)
    tgt = tgt_ref[...]                                       # (T, 1) int32
    t, c = pred.shape
    col = jax.lax.broadcasted_iota(jnp.int32, (t, c), 1)
    g = jnp.sum(jnp.where(col == tgt, pred, 0.0), axis=1, keepdims=True)          # (T, 1)
    m = jnp.max(pred, axis=1, keepdims=True)
    lse = m + jnp.log(jnp.sum(jnp.exp(pred - m), axis=1, keepdims=True))          # (T, 1)
    sum_pred = jnp.sum(pred, axis=1, keepdims=True)                               # (T, 1)
    lo = label_smooth / (class_num - 1)
    hi = 1.0 - label_smooth
    loss = (lo * class_num + (hi - lo)) * lse - lo * sum_pred - (hi - lo) * g     # (T, 1)
    _store_block_sum(out_ref, _block_row_mask_sum(loss, n_rows, tile))


def _ce_soft_kernel(pred_ref, soft_ref, out_ref, *, n_rows, tile):
    # loss_i = LSE_p(i) - (sum_j exp(s_ij - m_s) * pred_ij) / (sum_j exp(s_ij - m_s))
    # (no log_softmax(pred) tile, no full-tile divide)
    pred = pred_ref[...].astype(jnp.float32)                 # (T, C)
    soft = soft_ref[...].astype(jnp.float32)                 # (T, C)
    m_p = jnp.max(pred, axis=1, keepdims=True)
    lse_p = m_p + jnp.log(jnp.sum(jnp.exp(pred - m_p), axis=1, keepdims=True))    # (T, 1)
    m_s = jnp.max(soft, axis=1, keepdims=True)
    e_s = jnp.exp(soft - m_s)                                                     # (T, C)
    d = jnp.sum(e_s, axis=1, keepdims=True)                                       # (T, 1)
    wp = jnp.sum(e_s * pred, axis=1, keepdims=True)                               # (T, 1)
    # Per-row reciprocal keeps the divide off the (T, C) tile; flip approx=True when
    # ~1e-3 relative accuracy suffices (moves it fully onto the idle EUP slot).
    inv_d = pl.reciprocal(d, approx=False)
    loss = lse_p - wp * inv_d                                                     # (T, 1)
    _store_block_sum(out_ref, _block_row_mask_sum(loss, n_rows, tile))


# ---------------- tiling / VMEM heuristics ----------------

def _vmem_limits():
    """(vmem_limit_bytes, tile_budget_bytes) chosen per TPU generation."""
    try:
        cap = int(getattr(pltpu.get_tpu_info(), "vmem_capacity_bytes", 0))
    except Exception:
        cap = 0
    if cap <= 0:
        cap = 64 * 1024 * 1024                      # conservative fallback (v7x per-TC)
    limit = min((3 * cap) // 4, 96 * 1024 * 1024)   # 128 MiB parts -> 96 MiB, v7x -> 48 MiB
    limit = max(limit, 32 * 1024 * 1024)
    return limit, limit // 2                        # leave 2x headroom for internal scratch


def _bytes_per_row(c, in_itemsizes, f32_temps, with_target):
    """Honest VMEM bytes per row: lane padding, double-buffered inputs, f32 intermediates."""
    lanes = 128 * pl.cdiv(c, 128)                   # VMEM pads the lane dim to 128
    b = sum(2 * lanes * s for s in in_itemsizes)    # 2x: pipeline double buffering
    b += f32_temps * lanes * 4                      # in-kernel f32 (T, C)-scale temporaries
    if with_target:
        b += 2 * 128 * 4                            # (T, 1) int32 targets, lane-padded, 2 bufs
    return b


def _round_down(x, m):
    return (x // m) * m


def _choose_tile(n, bytes_per_row, pack, budget):
    t = int(budget // max(1, bytes_per_row))
    if t < 1 or (t < pack and t < n):
        # TODO(synk): tile the class dim with an online logsumexp (m/l in VMEM scratch).
        raise NotImplementedError(
            "CELoss Pallas kernel: class dimension too large for a single VMEM block; "
            "class-dim tiling not implemented yet.")
    if t >= n:
        t = n
    else:
        t = max(pack, _round_down(t, pack))         # respect the dtype sublane pack
    # Keep >=4 (else >=2) row blocks when N allows it so v7x's two TensorCores both get work.
    if n >= 4 * pack:
        t = min(t, max(pack, _round_down(pl.cdiv(n, 4), pack)))
    elif n >= 2 * pack:
        t = min(t, max(pack, _round_down(pl.cdiv(n, 2), pack)))
    return t


# ---------------- wrapper ----------------

class CELoss:
    """Cross Entropy Loss with label smoothing (Pallas TPU implementation)."""

    def __init__(self, label_smooth=None, class_num=4):
        self.label_smooth = label_smooth
        self.class_num = class_num

    def __call__(self, pred, target=None, soft_label=None):
        n, c = pred.shape
        itemsize = jnp.dtype(pred.dtype).itemsize
        pack = 8 * max(1, 4 // itemsize)            # 8 rows f32, 16 bf16, 32 int8 per vreg
        vmem_limit, budget = _vmem_limits()
        cp = pltpu.CompilerParams(
            dimension_semantics=("parallel",),      # row blocks are independent
            vmem_limit_bytes=vmem_limit,
        )

        if soft_label is not None:
            sl_item = jnp.dtype(soft_label.dtype).itemsize
            bpr = _bytes_per_row(c, (itemsize, sl_item), f32_temps=5, with_target=False)
            tile = _choose_tile(n, bpr, pack, budget)
            grid_n = pl.cdiv(n, tile)
            kern = functools.partial(_ce_soft_kernel, n_rows=n, tile=tile)
            fn = pl.pallas_call(
                kern,
                out_shape=jax.ShapeDtypeStruct((grid_n, 1, 128), jnp.float32),
                grid=(grid_n,),
                in_specs=[pl.BlockSpec((tile, c), lambda i: (i, 0)),
                          pl.BlockSpec((tile, c), lambda i: (i, 0))],
                out_specs=pl.BlockSpec((1, 1, 128), lambda i: (i, 0, 0)),
                compiler_params=cp,
            )
            per_block = fn(pred, soft_label)
        else:
            if target is None:
                raise ValueError("CELoss: `target` is required when `soft_label` is None")
            tgt2d = target.astype(jnp.int32).reshape(n, 1)
            bpr = _bytes_per_row(c, (itemsize,), f32_temps=4, with_target=True)
            tile = _choose_tile(n, bpr, pack, budget)
            grid_n = pl.cdiv(n, tile)
            if self.label_smooth is not None:
                if int(self.class_num) != c:
                    raise ValueError(
                        f"CELoss: class_num ({self.class_num}) must equal pred.shape[1] ({c})")
                kern = functools.partial(
                    _ce_smooth_kernel,
                    label_smooth=float(self.label_smooth),
                    class_num=int(self.class_num),
                    n_rows=n, tile=tile,
                )
            else:
                kern = functools.partial(_ce_plain_kernel, n_rows=n, tile=tile)
            fn = pl.pallas_call(
                kern,
                out_shape=jax.ShapeDtypeStruct((grid_n, 1, 128), jnp.float32),
                grid=(grid_n,),
                in_specs=[pl.BlockSpec((tile, c), lambda i: (i, 0)),
                          pl.BlockSpec((tile, 1), lambda i: (i, 0))],
                out_specs=pl.BlockSpec((1, 1, 128), lambda i: (i, 0, 0)),
                compiler_params=cp,
            )
            per_block = fn(pred, tgt2d)

        # Tiny final reduction over per-block partial sums (lane 0 holds each block's sum).
        # For the plain branch, torch's [N,1]+[N] broadcast-then-mean equals the per-row mean.
        return jnp.sum(per_block[:, 0, 0]) / jnp.float32(n)


# ---------------- pure-JAX references (for verification) ----------------

def _ref_plain(pred, target):
    eps = 1e-12
    g = jnp.take_along_axis(pred, target[:, None], axis=1)          # (N, 1)
    lse = jnp.log(jnp.sum(jnp.exp(pred + eps), axis=1))             # (N,)
    return jnp.mean(-1.0 * g + lse)                                 # broadcasts like torch


def _ref_smooth(pred, target, label_smooth, class_num):
    logprobs = jax.nn.log_softmax(pred, axis=1)
    onehot = jax.nn.one_hot(target, class_num, dtype=jnp.float32)
    t = jnp.clip(onehot, label_smooth / (class_num - 1), 1.0 - label_smooth)
    return jnp.mean(-jnp.sum(t * logprobs, axis=1))


def _ref_soft(pred, soft_label):
    logprobs = jax.nn.log_softmax(pred, axis=1)
    soft = jax.nn.softmax(soft_label, axis=1)
    return jnp.mean(-jnp.sum(logprobs * soft, axis=1))


if __name__ == "__main__":
    key = jax.random.PRNGKey(0)

    C = 4
    # N=20 exercises the multi-block path plus masking of the partial last block;
    # N=8 exercises the single full-block path.
    for N in (20, 8):
        k1, k2, k3, key = jax.random.split(key, 4)
        pred = jax.random.normal(k1, (N, C), dtype=jnp.float32)
        target = jax.random.randint(k2, (N,), 0, C, dtype=jnp.int32)
        soft_label = jax.random.normal(k3, (N, C), dtype=jnp.float32)

        # plain CE branch
        loss_plain = CELoss(label_smooth=None, class_num=C)(pred, target)
        jax.block_until_ready(loss_plain)
        assert jnp.allclose(loss_plain, _ref_plain(pred, target), atol=1e-5, rtol=1e-5)

        # label-smoothing branch
        loss_smooth = CELoss(label_smooth=0.1, class_num=C)(pred, target)
        jax.block_until_ready(loss_smooth)
        assert jnp.allclose(loss_smooth, _ref_smooth(pred, target, 0.1, C), atol=1e-5, rtol=1e-5)

        # soft-label branch
        loss_soft = CELoss(label_smooth=None, class_num=C)(pred, target, soft_label=soft_label)
        jax.block_until_ready(loss_soft)
        assert jnp.allclose(loss_soft, _ref_soft(pred, soft_label), atol=1e-5, rtol=1e-5)

    print("KERNEL_OK")
</pallas_src>

<mosaic_0001>
module attributes {stable_mosaic.version = 11 : i64} {
  func.func @_ce_plain_kernel(%arg0: i32, %arg1: memref<8x4xf32, #tpu.memory_space<vmem>>, %arg2: memref<8x1xi32, #tpu.memory_space<vmem>>, %arg3: memref<1x1x128xf32, #tpu.memory_space<vmem>>) attributes {dimension_semantics = [#tpu.dimension_semantics<parallel>], iteration_bounds = array<i64: 3>, scalar_prefetch = 0 : i64, scratch_operands = 0 : i64, tpu.core_type = #tpu.core_type<tc>, window_params = [{transform_indices = @transform_0, window_bounds = array<i64: 8, 4>}, {transform_indices = @transform_1, window_bounds = array<i64: 8, 1>}, {transform_indices = @transform_2, window_bounds = array<i64: 1, 1, 128>}]} {
    %c0 = arith.constant 0 : index
    %c0_0 = arith.constant 0 : index
    %0 = vector.load %arg1[%c0, %c0_0] : memref<8x4xf32, #tpu.memory_space<vmem>>, vector<8x4xf32>
    %c0_1 = arith.constant 0 : index
    %c0_2 = arith.constant 0 : index
    %1 = vector.load %arg2[%c0_1, %c0_2] : memref<8x1xi32, #tpu.memory_space<vmem>>, vector<8x1xi32>
    %2 = tpu.iota {dimensions = array<i32: 1>} : vector<8x4xi32>
    %3 = vector.broadcast %1 : vector<8x1xi32> to vector<8x4xi32>
    %4 = arith.cmpi eq, %2, %3 : vector<8x4xi32>
    %cst = arith.constant 0.000000e+00 : f32
    %5 = vector.broadcast %cst : f32 to vector<8x4xf32>
    %6 = arith.select %4, %0, %5 : vector<8x4xi1>, vector<8x4xf32>
    %cst_3 = arith.constant dense<0.000000e+00> : vector<8xf32>
    %7 = vector.multi_reduction <add>, %6, %cst_3 [1] : vector<8x4xf32> to vector<8xf32>
    %8 = vector.shape_cast %7 : vector<8xf32> to vector<8x1xf32>
    %cst_4 = arith.constant dense<0xFF800000> : vector<8xf32>
    %9 = vector.multi_reduction <maximumf>, %0, %cst_4 [1] : vector<8x4xf32> to vector<8xf32>
    %10 = vector.shape_cast %9 : vector<8xf32> to vector<8x1xf32>
    %11 = vector.broadcast %10 : vector<8x1xf32> to vector<8x4xf32>
    %12 = arith.subf %0, %11 : vector<8x4xf32>
    %13 = math.exp %12 : vector<8x4xf32>
    %cst_5 = arith.constant dense<0.000000e+00> : vector<8xf32>
    %14 = vector.multi_reduction <add>, %13, %cst_5 [1] : vector<8x4xf32> to vector<8xf32>
    %15 = vector.shape_cast %14 : vector<8xf32> to vector<8x1xf32>
    %16 = math.log %15 : vector<8x1xf32>
    %17 = arith.addf %10, %16 : vector<8x1xf32>
    %cst_6 = arith.constant 9.99999996E-13 : f32
    %18 = vector.broadcast %cst_6 : f32 to vector<8x1xf32>
    %19 = arith.addf %17, %18 : vector<8x1xf32>
    %20 = arith.subf %19, %8 : vector<8x1xf32>
    %21 = tpu.iota {dimensions = array<i32: 0>} : vector<8x1xi32>
    %c8_i32 = arith.constant 8 : i32
    %22 = arith.muli %arg0, %c8_i32 : i32
    %c20_i32 = arith.constant 20 : i32
    %23 = arith.subi %c20_i32, %22 : i32
    %24 = vector.broadcast %23 : i32 to vector<8x1xi32>
    %25 = arith.cmpi slt, %21, %24 : vector<8x1xi32>
    %cst_7 = arith.constant 0.000000e+00 : f32
    %26 = vector.broadcast %cst_7 : f32 to vector<8x1xf32>
    %27 = arith.select %25, %20, %26 : vector<8x1xi1>, vector<8x1xf32>
    %28 = vector.shape_cast %27 : vector<8x1xf32> to vector<1x8x1xf32>
    %cst_8 = arith.constant dense<0.000000e+00> : vector<1xf32>
    %29 = vector.multi_reduction <add>, %28, %cst_8 [1, 2] : vector<1x8x1xf32> to vector<1xf32>
    %30 = vector.shape_cast %29 : vector<1xf32> to vector<1x1x1xf32>
    %31 = vector.extract %30[0, 0, 0] : f32 from vector<1x1x1xf32>
    %32 = vector.broadcast %31 : f32 to vector<1x1x128xf32>
    %c0_9 = arith.constant 0 : index
    %c0_10 = arith.constant 0 : index
    %c0_11 = arith.constant 0 : index
    %33 = vector.load %arg3[%c0_9, %c0_10, %c0_11] : memref<1x1x128xf32, #tpu.memory_space<vmem>>, vector<1x1x128xf32>
    tpu.vector_store %arg3[%c0_9, %c0_10, %c0_11], %32 {strides = array<i32>} : memref<1x1x128xf32, #tpu.memory_space<vmem>>, vector<1x1x128xf32>,
    return
  }
  func.func @transform_0(%arg0: i32) -> (i32, i32) {
    %c0_i32 = arith.constant 0 : i32
    %c0_i32_0 = arith.constant 0 : i32
    return %arg0, %c0_i32 : i32, i32
  }
  func.func @transform_1(%arg0: i32) -> (i32, i32) {
    %c0_i32 = arith.constant 0 : i32
    %c0_i32_0 = arith.constant 0 : i32
    return %arg0, %c0_i32 : i32, i32
  }
  func.func @transform_2(%arg0: i32) -> (i32, i32, i32) {
    %c0_i32 = arith.constant 0 : i32
    %c0_i32_0 = arith.constant 0 : i32
    %c0_i32_1 = arith.constant 0 : i32
    return %arg0, %c0_i32, %c0_i32_0 : i32, i32, i32
  }
}

</mosaic_0001>

<bundles_post_ra>
// kernel: tpu_custom_call.1
= control target key start
LH: loop header
LB: loop body
LE: loop exit
PB: predicated region body
PF: predicated region fallthrough
CT: control target
= control target key end

     0   :  { %7 = vsyncpa [#allocation3], 0  ;;  %s518_s0 = inlined_call_operand.vmem [shape: f32[20,4], index: 0, kind: input, shape index: {}]   ;;  %s519_s1 = inlined_call_operand.vmem [shape: s32[20,1], index: 1, kind: input, shape index: {}]   ;;  %s520_s2 = inlined_call_operand.hbm [shape: f32[3,1,128], index: 2, kind: output, shape index: {}]  }
   0x1   :  { %9 = vsyncpa [#allocation3 + $0x1], 0  ;;  %s418_s9 = smov 0   ;;  %s420_s10 = smov 0  }
   0x2   :  { %s422_s11 = smov 0   ;;  %s424_s12 = smov 0  }
   0x3 LB: > { %s439_s13 = sadd.s32 4294967295, %s399_s12   ;;  %s282_s14 = sadd.s32 4294967294, %s399_s12   ;;  %s399_s12 = sphi %s424_s12, %s526_s12   ;;  %s395_s11 = sphi %s422_s11, %s525_s11   ;;  %s391_s10 = sphi %s420_s10, %s524_s10   ;;  %s387_s9 = sphi %s418_s9, %s523_s9  }
   0x4   : > { %s443_s15 = sadd.s32 1, %s399_s12   ;;  %s74_s16 = sadd.s32 1, %s395_s11 }
   0x5   : > { %s71_s17 = ssub.s32 %s399_s12, %s443_s15  ;;  %p84_p0 = scmp.ne.s32.totalorder %s395_s11, %s391_s10 }
   0x6   : > { %p72_p1 = scmp.eq.s32.totalorder %s71_s17, 0  ;;  %p85_p2 = scmp.eq.s32.totalorder %s439_s13, 2 }
   0x7   : > { %p90_p3 = scmp.ne.s32.totalorder %s391_s10, %s387_s9  ;;  %p91_p4 = scmp.eq.s32.totalorder %s282_s14, 2 }
   0x8   : > { %s454_s18 = scalar_select %p72_p1, %s395_s11, %s74_s16  }
   0x9   : > { %p456_p5 = por %p85_p2, %p84_p0  ;;  %p460_p6 = por %p91_p4, %p90_p3 }
   0xa   : > { %p285_p7 = scmp.ge.s32.totalorder %s399_s12, 1  ;;  %p123_p8 = scmp.lt.s32.totalorder %s399_s12, 4 }
   0xc   : > { %p124_p9 = pnand %p285_p7, %p123_p8 }
   0xd   : > { %p147_p10 = scmp.lt.s32.totalorder (!%p124_p9), %s439_s13, 2  ;;  %s288_s29 = sshll.u32 (!%p124_p9), %s439_s13, 3 }
   0xe   : > { %127 = sbr.rel (%p124_p9) target bundleno = 558 (0x22e), region = 28  ;;  %s185_s30 = ssub.s32 (!%p124_p9), 20, %s288_s29 }
   0xf   : > { %s145_s3 = sand.u32 (!%p124_p9), 1, %s391_s10   ;;  %s289_s6 = sshll.u32 (!%p124_p9), %s439_s13, 4 }
  0x10   : > { %s146_s4 = scalar_lea.vmem (!%p124_p9), [#allocation2], %s145_s3  ;;  %s213_s16 = scalar_lea.hbm (!%p124_p9), %s520_s2, %s289_s6 }
  0x11   : > { %s215_s5 = sshll.u32 (!%p124_p9), %s146_s4, 4  ;;  %s203_s17 = scalar_lea.sflag (!%p124_p9), [#allocation3], %s145_s3  ;;  %s480_s5 = int_to_ptr.vmem [resolvable:$true] %s215_s5 }
  0x13   : > { %v401_v0 = vmov 0   ;;  %s148_s21 = scalar_select %p147_p10, %s439_s13, 2  ;;  %vm164_vm0 = vcmask 31744   ;;  %v157_v7 = vlaneseq  ;;  %v186_v19 = vstv %s185_s30 }
  0x14   : > { %334 = vset.pattern.permute.xlu0 %v401_v0  ;;  %vm189_vm3 = vcmask 7168  }
  0x15   : > { %s286_s22 = sshll.u32 %s148_s21, 3  ;;  %v158_v8 = vand.u32 127, %v157_v7  ;;  %v183_v17 = vshrl.u32 %v157_v7, 7  ;;  %s339_s21 = scalar_lea.vmem %s480_s5, 16 }
  0x16   : > { %s150_s25 = scalar_lea.vmem %s518_s0, %s286_s22  ;;  %s154_s28 = scalar_lea.vmem %s519_s1, %s286_s22 }
  0x17   : > { %v155_v1 = vld [vmem:[%s150_s25] sm:$0xff]  ;;  %vm187_vm2 = vcmp.lt.s32.totalorder %v183_v17, %v186_v19  ;;  %p340_p11 = scmp.ne.s32.totalorder %s480_s5, %s339_s21  ;;  %s402_s22 = smov [#allocation2]  }
  0x18   : > { %v168_v2 = vsel %vm164_vm0, %v155_v1, -inf  ;;  %v156_v3 = vld [vmem:[%s154_s28] sm:$0xff]  ;;  %s343_s13 = sshll.u32 %s402_s22, 4  ;;  %s344_s13 = int_to_ptr.vmem [resolvable:$false] %s343_s13 }
  0x19   : > { %169 = vmax.xlane.f32.xlu0 %v168_v2  ;;  %p341_p12 = pnand %p340_p11, %p456_p5  ;;  %s345_s23 = scalar_lea.vmem %s344_s13, 32 }
  0x1a   : > { %p346_p0 = scmp.lt.s32.totalorder %s480_s5, %s344_s13  ;;  %p347_p1 = scmp.lt.s32.totalorder %s345_s23, %s339_s21 }
  0x1b   : > { %p342_p13 = pneg %p341_p12 }
  0x1c   : > { %p348_p2 = por %p347_p1, %p346_p0 }
  0x1e   : > { %p349_p3 = pnand %p348_p2, %p342_p13 }
  0x2f   : > { %160 = vperm.xlu0 %334, %v156_v3  }
  0xa2   : > { %v170_v4 = vpop.xlane.xlu0 %169 }
  0xa3   : > { %v171_v5 = vsub.f32 %v155_v1, %v170_v4 }
  0xa5   : > { %v172_v6 = vmul.f32 1.442695, %v171_v5 }
  0xa7   : > { %335 = vpow2.f32 %v172_v6 }
  0xaa   : > { %v161_v9 = vpop.permute.xlu0 %160 }
  0xab   : > { %vm162_vm1 = vcmp.eq.s32.totalorder %v158_v8, %v161_v9 }
  0xac   : > { %v163_v11 = vsel %vm162_vm1, %v155_v1, 0.0 }
  0xad   : > { %v165_v13 = vsel %vm164_vm0, %v163_v11, 0.0 }
  0xb4   : > { %v336_v10 = vpop.eup %335 }
  0xb5   : > { %v174_v12 = vsel %vm164_vm0, %v336_v10, 0.0 }
  0xb6   : > { %175 = vadd.xlane.f32.xlu1 %v174_v12 }
  0xba   : > { %166 = vadd.xlane.f32.xlu1 %v165_v13 }
 0x13f   : > { %v176_v14 = vpop.xlane.xlu1 %175 }
 0x140   : > { %337 = vlog2.f32 %v176_v14 }
 0x143   : > { %v167_v20 = vpop.xlane.xlu1 %166 }
 0x14d   : > { %v338_v15 = vpop.eup %337 }
 0x14e   : > { %v178_v16 = vmul.f32 0.6931472, %v338_v15 }
 0x150   : > { %v179_v18 = vadd.f32 %v178_v16, %v170_v4 }
 0x152   : > { %v180_v21 = vadd.f32 1e-12, %v179_v18 }
 0x154   : > { %v181_v22 = vsub.f32 %v180_v21, %v167_v20 }
 0x156   : > { %v188_v23 = vsel %vm187_vm2, %v181_v22, 0.0 }
 0x157   : > { %v190_v24 = vsel %vm189_vm3, %v188_v23, 0.0 }
 0x158   : > { %191 = vadd.xlane.f32.xlu1 %v190_v24 }
 0x1e1   : > { %v192_v25 = vpop.xlane.xlu1 %191 }
 0x1e2   : > { %v193_v26 = vrot.slane %v192_v25, 4 }
 0x1e4   : > { %v194_v27 = vadd.f32 %v193_v26, %v192_v25 }
 0x1e6   : > { %v195_v28 = vrot.slane %v194_v27, 2 }
 0x1e8   : > { %v196_v29 = vadd.f32 %v195_v28, %v194_v27 }
 0x1ea   : > { %v197_v30 = vrot.slane %v196_v29, 1 }
 0x1ec   : > { %v198_v31 = vadd.f32 %v197_v30, %v196_v29 }
 0x1ee   : > { %292 = vpush %v198_v31 }
 0x21f   : > { %s293_s7 = spop %292 }
 0x220   : > { %v200_v32 = vstv %s293_s7 }
 0x221   : > { %201 = vst [vmem:[%s146_s4] sm:$0x1] %v200_v32 }
 0x222   : > { %352 = shalt.err (!%p349_p3)
}
 0x223   : > { %s353_s24 = scalar_lea.hbm %s213_s16, 16  ;;  %s357_s27 = scalar_lea.hbm %s520_s2, 48 }
 0x224   : > { %p354_p4 = scmp.ne.s32.totalorder %s213_s16, %s353_s24  ;;  %p358_p9 = scmp.lt.s32.totalorder %s213_s16, %s520_s2 }
 0x225   : > { %p359_p10 = scmp.lt.s32.totalorder %s357_s27, %s353_s24 }
 0x226   : > { %p355_p7 = pnand %p354_p4, %p456_p5 }
 0x227   : > { %p360_p11 = por %p359_p10, %p358_p9 }
 0x228   : > { %p356_p8 = pneg %p355_p7 }
 0x22a   : > { %p361_p12 = pnand %p360_p11, %p356_p8 }
 0x22c   : > { %364 = shalt.err (!%p361_p12)
}
 0x22d   : > { %294 = dma.vmem_to_hbm [thread:$0]  (%p456_p5), %s480_s5, 16, %s213_s16, %s203_s17  }
 0x22e PF: > { %p300_p13 = scmp.ge.s32.totalorder %s399_s12, 2  ;;  %s227_s30 = sand.u32 1, %s387_s9  }
 0x22f   : > { %s228_s3 = scalar_lea.sflag [#allocation3], %s227_s30 }
 0x230   : > { %p297_p0 = pnand %p300_p13, %p460_p6 }
 0x232   : > { %p298_p1 = pneg %p297_p0 }
 0x234   : > { %382 = dma.done.wait (%p298_p1), %s228_s3, 16  }
 0x235   : > { %384 = vsyncadd (%p298_p1), %s228_s3, 4294967280  ;;  %p12_p2 = scmp.ge.s32.totalorder %s443_s15, 5   ;;  %s523_s9 = smov %s391_s10 }
 0x236   : > { %s524_s10 = smov %s395_s11  ;;  %s525_s11 = smov %s454_s18 }
 0x237   : > { %s526_s12 = smov %s443_s15  ;;  %14 = sbr.rel (!%p12_p2) target bundleno = 3 (0x3), region = 66 }
 0x23c   :  { %232 = vsyncpa [#allocation3], 1 }
 0x23d   :  { %234 = vsyncpa [#allocation3 + $0x1], 1 }

</bundles_post_ra>
